<compile_context>
chip_gen: v7x
topology: tpu7x:2x2x1
jax: 0.10.0
libtpu: 0.0.40
codegen_flags: <defaults>
</compile_context>

<pallas_src>
import jax
import jax.numpy as jnp
from jax.experimental import pallas as pl
from jax.experimental.pallas import tpu as pltpu


def _adaptive_loss_kernel(losses_ref, log_vars_ref, out_ref):
    # losses_ref, log_vars_ref: (1, N) f32 in VMEM (full-extent blocks).
    ls = losses_ref[...]                       # (1, N)
    lv = log_vars_ref[...]                     # (1, N)
    # precision * loss + log_var, elementwise (VPU + EUP), then XLU lane-reduce.
    weighted = jnp.exp(-lv) * ls + lv
    out_ref[0] = jnp.sum(weighted)             # scalar -> 1-D SMEM output


def _forward_pallas(losses, log_vars):
    """losses, log_vars: (N,) f32 arrays. Returns scalar f32 total loss."""
    n = losses.shape[0]
    ls2 = losses.reshape(1, n)
    lv2 = log_vars.reshape(1, n)
    out = pl.pallas_call(
        _adaptive_loss_kernel,
        out_shape=jax.ShapeDtypeStruct((1,), jnp.float32),
        in_specs=[
            pl.BlockSpec((1, n), lambda: (0, 0)),   # losses (full block)
            pl.BlockSpec((1, n), lambda: (0, 0)),   # log_vars (full block)
        ],
        out_specs=pl.BlockSpec(memory_space=pltpu.MemorySpace.SMEM),
        cost_estimate=pl.CostEstimate(
            flops=3 * n,
            transcendentals=n,
            bytes_accessed=2 * 4 * n + 4,
        ),
    )(ls2, lv2)
    return out[0]


# --- differentiable wrapper: log_vars is the trainable parameter --------------
@jax.custom_vjp
def _adaptive_loss_weighting_core(losses, log_vars):
    return _forward_pallas(losses, log_vars)


def _alw_fwd(losses, log_vars):
    return _forward_pallas(losses, log_vars), (losses, log_vars)


def _alw_bwd(res, g):
    losses, log_vars = res
    precision = jnp.exp(-log_vars)
    d_losses = g * precision
    d_log_vars = g * (1.0 - precision * losses)
    return d_losses, d_log_vars


_adaptive_loss_weighting_core.defvjp(_alw_fwd, _alw_bwd)


def adaptive_loss_weighting(losses, log_vars):
    """Forward of AdaptiveLossWeighting.

    Args:
      losses: (N,) f32 array of per-task scalar losses (preferred hot path),
              or a list/tuple of scalar arrays (cold-path convenience only;
              packing N separate 0-d device arrays per call is slow).
      log_vars: (N,) f32 learned parameter.
    Returns:
      scalar f32 total loss.
    """
    if isinstance(losses, (list, tuple)):
        # Cold path only: prefer passing a packed (N,) array from the caller.
        losses = jnp.stack([jnp.asarray(l, jnp.float32).reshape(()) for l in losses])
    losses = jnp.asarray(losses, jnp.float32).reshape(-1)
    log_vars = jnp.asarray(log_vars, jnp.float32).reshape(-1)
    assert log_vars.shape[0] == losses.shape[0], (log_vars.shape, losses.shape)
    return _adaptive_loss_weighting_core(losses, log_vars)


if __name__ == "__main__":
    num_losses = 4
    key = jax.random.PRNGKey(0)
    k_loss, k_lv = jax.random.split(key)

    # Deterministic per-task scalar losses, packed once as a single (N,) array.
    loss_vals = jax.random.uniform(k_loss, (num_losses,), dtype=jnp.float32) * 3.0

    # Case 1: parameter init exactly as nn.Parameter(torch.zeros(num_losses)).
    log_vars_zero = jnp.zeros((num_losses,), dtype=jnp.float32)
    total_zero = jax.block_until_ready(adaptive_loss_weighting(loss_vals, log_vars_zero))
    ref_zero = jnp.sum(jnp.exp(-log_vars_zero) * loss_vals + log_vars_zero)
    assert jnp.allclose(total_zero, ref_zero, rtol=1e-6, atol=1e-6), (total_zero, ref_zero)

    # Case 2: non-zero log_vars to exercise the exp(-log_var) path.
    log_vars_rand = jax.random.normal(k_lv, (num_losses,), dtype=jnp.float32) * 0.5
    total_rand = jax.block_until_ready(adaptive_loss_weighting(loss_vals, log_vars_rand))
    ref_rand = jnp.sum(jnp.exp(-log_vars_rand) * loss_vals + log_vars_rand)
    assert jnp.allclose(total_rand, ref_rand, rtol=1e-6, atol=1e-6), (total_rand, ref_rand)

    # Case 3: gradient w.r.t. the trainable log_vars (custom VJP path).
    grad_fn = jax.grad(lambda lv: adaptive_loss_weighting(loss_vals, lv))
    g_kernel = jax.block_until_ready(grad_fn(log_vars_rand))
    g_ref = jax.grad(
        lambda lv: jnp.sum(jnp.exp(-lv) * loss_vals + lv)
    )(log_vars_rand)
    assert jnp.allclose(g_kernel, g_ref, rtol=1e-6, atol=1e-6), (g_kernel, g_ref)

    print("KERNEL_OK")
</pallas_src>

<mosaic_0001>
module attributes {stable_mosaic.version = 11 : i64} {
  func.func @_adaptive_loss_kernel(%arg0: memref<1x4xf32, #tpu.memory_space<vmem>>, %arg1: memref<1x4xf32, #tpu.memory_space<vmem>>, %arg2: memref<1xf32, #tpu.memory_space<smem>>) attributes {dimension_semantics = [], scalar_prefetch = 0 : i64, scratch_operands = 0 : i64, tpu.core_type = #tpu.core_type<tc>} {
    %c0 = arith.constant 0 : index
    %c0_0 = arith.constant 0 : index
    %0 = vector.load %arg0[%c0, %c0_0] : memref<1x4xf32, #tpu.memory_space<vmem>>, vector<1x4xf32>
    %c0_1 = arith.constant 0 : index
    %c0_2 = arith.constant 0 : index
    %1 = vector.load %arg1[%c0_1, %c0_2] : memref<1x4xf32, #tpu.memory_space<vmem>>, vector<1x4xf32>
    %cst = arith.constant 0.000000e+00 : f32
    %2 = vector.broadcast %cst : f32 to vector<1x4xf32>
    %3 = arith.subf %2, %1 : vector<1x4xf32>
    %4 = math.exp %3 : vector<1x4xf32>
    %5 = arith.mulf %4, %0 : vector<1x4xf32>
    %6 = arith.addf %5, %1 : vector<1x4xf32>
    %7 = vector.shape_cast %6 : vector<1x4xf32> to vector<1x1x4xf32>
    %cst_3 = arith.constant dense<0.000000e+00> : vector<1xf32>
    %8 = vector.multi_reduction <add>, %7, %cst_3 [1, 2] : vector<1x1x4xf32> to vector<1xf32>
    %9 = vector.shape_cast %8 : vector<1xf32> to vector<1x1x1xf32>
    %10 = vector.extract %9[0, 0, 0] : f32 from vector<1x1x1xf32>
    %c0_4 = arith.constant 0 : index
    %11 = memref.load %arg2[%c0_4] : memref<1xf32, #tpu.memory_space<smem>>
    memref.store %10, %arg2[%c0_4] : memref<1xf32, #tpu.memory_space<smem>>
    return
  }
}

</mosaic_0001>

<bundles_post_ra>
// kernel: tpu_custom_call.1
= control target key start
LH: loop header
LB: loop body
LE: loop exit
PB: predicated region body
PF: predicated region fallthrough
CT: control target
= control target key end

     0   :  { %7 = vsyncpa [#allocation3], 0  ;;  %s144_s0 = inlined_call_operand.hbm [shape: f32[1,4], index: 0, kind: input, shape index: {}]   ;;  %s145_s1 = inlined_call_operand.vmem [shape: f32[1,4], index: 1, kind: input, shape index: {}]   ;;  %s146_s2 = inlined_call_operand.hbm [shape: f32[1], index: 2, kind: output, shape index: {}]  }
   0x1   :  { %8 = vsyncpa [#allocation4], 0  ;;  %s100_s9 = smov [#allocation2]   ;;  %s64_s13 = scalar_lea.hbm %s144_s0, 16 }
   0x2   :  { %s15_s10 = sshll.u32 %s100_s9, 4  ;;  %p65_p0 = scmp.ne.s32.totalorder %s144_s0, %s64_s13  ;;  %s16_s10 = int_to_ptr.vmem [resolvable:$true] %s15_s10 }
   0x3   :  { %p68_p1 = scmp.lt.u32.totalorder %s64_s13, %s144_s0 }
   0x5   :  { %p70_p2 = pnand %p68_p1, %p65_p0 }
   0x7   :  { %73 = shalt.err (!%p70_p2)
}
   0x8   :  { %s74_s18 = scalar_lea.vmem %s16_s10, 16  ;;  %s78_s19 = scalar_lea.vmem %s16_s10, 32 }
   0x9   :  { %p75_p3 = scmp.ne.s32.totalorder %s16_s10, %s74_s18  ;;  %p79_p4 = scmp.lt.s32.totalorder %s16_s10, %s16_s10 }
   0xa   :  { %p80_p5 = scmp.lt.s32.totalorder %s78_s19, %s74_s18 }
   0xc   :  { %p81_p6 = por %p80_p5, %p79_p4 }
   0xe   :  { %p82_p7 = pnand %p81_p6, %p75_p3 }
  0x10   :  { %85 = shalt.err (!%p82_p7)
}
  0x11   :  { %18 = dma.hbm_to_vmem [thread:$0]  %s144_s0, 16, %s16_s10, [#allocation3]  }
  0x12   :  { %96 = dma.done.wait [#allocation3], 16  }
  0x13   :  { %97 = vsyncadd [#allocation3], 4294967280  ;;  %v25_v0 = vld [vmem:[%s145_s1] sm:$0x1]  ;;  %vm31_vm0 = vcmask 24576   ;;  %s86_s25 = scalar_lea.hbm %s146_s2, 16 }
  0x14   :  { %v26_v1 = vsub.f32 0.0, %v25_v0  ;;  %v24_v3 = vld [vmem:[#allocation2] sm:$0x1]  ;;  %p87_p8 = scmp.ne.s32.totalorder %s146_s2, %s86_s25  ;;  %p90_p9 = scmp.lt.u32.totalorder %s86_s25, %s146_s2 }
  0x16   :  { %v27_v2 = vmul.f32 1.442695, %v26_v1  ;;  %p92_p10 = pnand %p90_p9, %p87_p8 }
  0x18   :  { %62 = vpow2.f32 %v27_v2 }
  0x22   :  { %v63_v4 = vpop.eup %62 }
  0x23   :  { %v29_v5 = vmul.f32 %v63_v4, %v24_v3 }
  0x25   :  { %v30_v6 = vadd.f32 %v29_v5, %v25_v0 }
  0x27   :  { %v32_v7 = vsel %vm31_vm0, %v30_v6, 0.0 }
  0x28   :  { %33 = vadd.xlane.f32.xlu0 %v32_v7 }
  0xb5   :  { %v34_v8 = vpop.xlane.xlu0 %33 }
  0xb6   :  { %v35_v9 = vrot.slane %v34_v8, 4 }
  0xb8   :  { %v36_v10 = vadd.f32 %v35_v9, %v34_v8 }
  0xba   :  { %v37_v11 = vrot.slane %v36_v10, 2 }
  0xbc   :  { %v38_v12 = vadd.f32 %v37_v11, %v36_v10 }
  0xbe   :  { %v39_v13 = vrot.slane %v38_v12, 1 }
  0xc0   :  { %v40_v14 = vadd.f32 %v39_v13, %v38_v12 }
  0xc2   :  { %58 = vpush %v40_v14 }
  0xf3   :  { %s59_s0 = spop %58 }
  0xf4   :  { %43 = sst [smem:[#allocation5]] %s59_s0 }
  0xf5   :  { %95 = shalt.err (!%p92_p10)
}
  0xf6   :  { %s101_s30 = smov [#allocation5]  }
  0xf7   :  { %51 = dma.smem_to_hbm %s101_s30, 16, %s146_s2, [#allocation4]  }
  0xf8   :  { %98 = dma.done.wait [#allocation4], 16  }
  0xf9   :  { %99 = vsyncadd [#allocation4], 4294967280 }
  0xfa   :  { %55 = sfence }
  0xfb   :  { %56 = vsyncpa [#allocation3], 1 }
  0xfc   :  { %57 = vsyncpa [#allocation4], 1 }

</bundles_post_ra>
